<compile_context>
chip_gen: v7x
topology: tpu7x:2x2x1
jax: 0.10.0
libtpu: 0.0.40
codegen_flags: <defaults>
</compile_context>

<pallas_src>
import functools

import jax
import jax.numpy as jnp
from jax import lax
from jax.experimental import pallas as pl
from jax.experimental.pallas import tpu as pltpu


def _lrn_kernel(x_ref, o_ref, pad_ref, *, nbd_len, alpha, beta, k):
    # x_ref block: (1, C, T) -> operate on the (C, T) tile.
    x = x_ref[0]
    C, T = x.shape
    left = nbd_len // 2            # zero pad before channel 0
    right = (nbd_len - 1) // 2     # zero pad after channel C-1

    xf = x.astype(jnp.float32)
    sq = xf * xf

    # Stage sq into the channel-padded scratch: rows [left, left+C) hold sq,
    # the pad rows are zero.  The window sum then becomes static slice loads
    # (no concatenate temps / zero-filled full-tile copies).
    if left > 0:
        pad_ref[pl.ds(0, left), :] = jnp.zeros((left, T), jnp.float32)
    pad_ref[pl.ds(left, C), :] = sq
    if right > 0:
        pad_ref[pl.ds(left + C, right), :] = jnp.zeros((right, T), jnp.float32)

    acc = sq                                   # tap d == left is sq itself
    for d in range(nbd_len):                   # static unroll, nbd_len-1 slice loads
        if d == left:
            continue
        acc = acc + pad_ref[pl.ds(d, C), :]

    denom = acc * (alpha / nbd_len) + k        # >= k > 0, safe for fractional power

    # out = x * denom**(-beta): no divide, no generic pow.
    if abs(beta - 0.75) < 1e-12:
        inv = lax.rsqrt(denom) * lax.rsqrt(jnp.sqrt(denom))   # denom**-0.75
    elif abs(beta - 0.5) < 1e-12:
        inv = lax.rsqrt(denom)                                # denom**-0.5
    else:
        inv = jnp.exp((-beta) * jnp.log(denom))               # general beta

    o_ref[0] = (xf * inv).astype(o_ref.dtype)


def _choose_spatial_tile(hw, c, dtype_bytes, max_block_bytes=1 << 20):
    """Pick a lane-aligned spatial tile T for blocks of shape (1, C, T).

    Keeps C*T*dtype_bytes under ~1 MiB so (2 bufs x in/out) + scratch + temps fit
    the most restrictive default scoped VMEM (16 MiB on v5e, 32 MiB on v6e/v7x).
    """
    if hw < 128:
        return hw                                  # full-extent block (allowed)
    cap = (max_block_bytes // (c * dtype_bytes)) // 128 * 128
    cap = max(128, min(2048, cap))
    if hw % 128 == 0:
        # Prefer a tile that divides HW exactly (no masked edge blocks).
        best = 128
        for t in range(128, min(hw, cap) + 1, 128):
            if hw % t == 0:
                best = t
        return best
    # HW not lane-aligned: lane-aligned tile with a ragged (masked) last block.
    return min(cap, (hw // 128) * 128)


def local_response_normalization(x, *, nbd_len=5, alpha=1e-4, beta=0.75, k=2.0):
    """x: (N, C, H, W) -> (N, C, H, W), cross-channel LRN."""
    N, C, H, W = x.shape
    HW = H * W
    x_flat = x.reshape(N, C, HW)

    T = _choose_spatial_tile(HW, C, x.dtype.itemsize)
    grid = (N, pl.cdiv(HW, T))

    kernel = functools.partial(
        _lrn_kernel, nbd_len=nbd_len, alpha=alpha, beta=beta, k=k
    )

    total = N * C * HW
    cost = pl.CostEstimate(
        flops=(nbd_len + 4) * total,
        transcendentals=3 * total,
        bytes_accessed=2 * total * x.dtype.itemsize,
    )

    out_flat = pl.pallas_call(
        kernel,
        out_shape=jax.ShapeDtypeStruct((N, C, HW), x.dtype),
        grid_spec=pltpu.PrefetchScalarGridSpec(
            num_scalar_prefetch=0,
            grid=grid,
            in_specs=[pl.BlockSpec((1, C, T), lambda n, t: (n, 0, t))],
            out_specs=pl.BlockSpec((1, C, T), lambda n, t: (n, 0, t)),
            scratch_shapes=[pltpu.VMEM((C + nbd_len - 1, T), jnp.float32)],
        ),
        compiler_params=pltpu.CompilerParams(
            dimension_semantics=("parallel", "parallel"),
            vmem_limit_bytes=32 * 1024 * 1024,
        ),
        cost_estimate=cost,
    )(x_flat)

    return out_flat.reshape(N, C, H, W)


def _lrn_reference(x, *, nbd_len=5, alpha=1e-4, beta=0.75, k=2.0):
    # Pure-JAX reference mirroring the PyTorch forward (4-D branch).
    N, C, H, W = x.shape
    sq = x * x
    pad_l = nbd_len // 2
    pad_r = (nbd_len - 1) // 2
    sq_p = jnp.pad(sq, ((0, 0), (pad_l, pad_r), (0, 0), (0, 0)))
    denom = jnp.zeros_like(x)
    for i in range(nbd_len):
        denom = denom + sq_p[:, i:i + C]
    denom = denom / nbd_len
    denom = (denom * alpha + k) ** beta
    return x / denom


if __name__ == "__main__":
    key = jax.random.PRNGKey(0)
    # Small shape consistent with the module's 4-D (NCHW) forward path.
    x = jax.random.normal(key, (2, 4, 16, 16), dtype=jnp.float32)

    # Deterministic LRN hyperparameters (AlexNet defaults).
    params = dict(nbd_len=5, alpha=1e-4, beta=0.75, k=2.0)

    out = local_response_normalization(x, **params)
    out = jax.block_until_ready(out)

    ref = _lrn_reference(x, **params)
    if not jnp.allclose(out, ref, atol=1e-5, rtol=1e-5):
        raise AssertionError("Pallas LRN does not match reference")

    print("KERNEL_OK")
</pallas_src>

<mosaic_0001>
module attributes {stable_mosaic.version = 11 : i64} {
  func.func @_lrn_kernel(%arg0: i32, %arg1: i32, %arg2: memref<1x4x256xf32, #tpu.memory_space<vmem>>, %arg3: memref<1x4x256xf32, #tpu.memory_space<vmem>>, %arg4: memref<8x256xf32, #tpu.memory_space<vmem>>) attributes {dimension_semantics = [#tpu.dimension_semantics<parallel>, #tpu.dimension_semantics<parallel>], iteration_bounds = array<i64: 2, 1>, scalar_prefetch = 0 : i64, scratch_operands = 1 : i64, tpu.core_type = #tpu.core_type<tc>, window_params = [{transform_indices = @transform_0, window_bounds = array<i64: 1, 4, 256>}, {transform_indices = @transform_1, window_bounds = array<i64: 1, 4, 256>}]} {
    %c0 = arith.constant 0 : index
    %c0_0 = arith.constant 0 : index
    %c0_1 = arith.constant 0 : index
    %0 = vector.load %arg2[%c0, %c0_0, %c0_1] : memref<1x4x256xf32, #tpu.memory_space<vmem>>, vector<1x4x256xf32>
    %1 = vector.shape_cast %0 : vector<1x4x256xf32> to vector<4x256xf32>
    %2 = arith.mulf %1, %1 : vector<4x256xf32>
    %cst = arith.constant 0.000000e+00 : f32
    %3 = vector.broadcast %cst : f32 to vector<2x256xf32>
    %c0_2 = arith.constant 0 : index
    %c0_3 = arith.constant 0 : index
    %4 = vector.load %arg4[%c0_2, %c0_3] : memref<8x256xf32, #tpu.memory_space<vmem>>, vector<2x256xf32>
    tpu.vector_store %arg4[%c0_2, %c0_3], %3 {strides = array<i32>} : memref<8x256xf32, #tpu.memory_space<vmem>>, vector<2x256xf32>,
    %c2 = arith.constant 2 : index
    %c0_4 = arith.constant 0 : index
    %5 = vector.load %arg4[%c2, %c0_4] : memref<8x256xf32, #tpu.memory_space<vmem>>, vector<4x256xf32>
    tpu.vector_store %arg4[%c2, %c0_4], %2 {strides = array<i32>} : memref<8x256xf32, #tpu.memory_space<vmem>>, vector<4x256xf32>,
    %cst_5 = arith.constant 0.000000e+00 : f32
    %6 = vector.broadcast %cst_5 : f32 to vector<2x256xf32>
    %c6 = arith.constant 6 : index
    %c0_6 = arith.constant 0 : index
    %7 = vector.load %arg4[%c6, %c0_6] : memref<8x256xf32, #tpu.memory_space<vmem>>, vector<2x256xf32>
    tpu.vector_store %arg4[%c6, %c0_6], %6 {strides = array<i32>} : memref<8x256xf32, #tpu.memory_space<vmem>>, vector<2x256xf32>,
    %c0_7 = arith.constant 0 : index
    %c0_8 = arith.constant 0 : index
    %8 = vector.load %arg4[%c0_7, %c0_8] : memref<8x256xf32, #tpu.memory_space<vmem>>, vector<4x256xf32>
    %9 = arith.addf %2, %8 : vector<4x256xf32>
    %c1 = arith.constant 1 : index
    %c0_9 = arith.constant 0 : index
    %10 = vector.load %arg4[%c1, %c0_9] : memref<8x256xf32, #tpu.memory_space<vmem>>, vector<4x256xf32>
    %11 = arith.addf %9, %10 : vector<4x256xf32>
    %c3 = arith.constant 3 : index
    %c0_10 = arith.constant 0 : index
    %12 = vector.load %arg4[%c3, %c0_10] : memref<8x256xf32, #tpu.memory_space<vmem>>, vector<4x256xf32>
    %13 = arith.addf %11, %12 : vector<4x256xf32>
    %c4 = arith.constant 4 : index
    %c0_11 = arith.constant 0 : index
    %14 = vector.load %arg4[%c4, %c0_11] : memref<8x256xf32, #tpu.memory_space<vmem>>, vector<4x256xf32>
    %15 = arith.addf %13, %14 : vector<4x256xf32>
    %cst_12 = arith.constant 2.000000e-05 : f32
    %16 = vector.broadcast %cst_12 : f32 to vector<4x256xf32>
    %17 = arith.mulf %15, %16 : vector<4x256xf32>
    %cst_13 = arith.constant 2.000000e+00 : f32
    %18 = vector.broadcast %cst_13 : f32 to vector<4x256xf32>
    %19 = arith.addf %17, %18 : vector<4x256xf32>
    %20 = math.rsqrt %19 : vector<4x256xf32>
    %21 = math.sqrt %19 : vector<4x256xf32>
    %22 = math.rsqrt %21 : vector<4x256xf32>
    %23 = arith.mulf %20, %22 : vector<4x256xf32>
    %24 = arith.mulf %1, %23 : vector<4x256xf32>
    %c0_14 = arith.constant 0 : index
    %c0_15 = arith.constant 0 : index
    %c0_16 = arith.constant 0 : index
    %25 = vector.load %arg3[%c0_14, %c0_15, %c0_16] : memref<1x4x256xf32, #tpu.memory_space<vmem>>, vector<1x4x256xf32>
    %26 = vector.shape_cast %25 : vector<1x4x256xf32> to vector<4x256xf32>
    %27 = vector.shape_cast %24 : vector<4x256xf32> to vector<1x4x256xf32>
    tpu.vector_store %arg3[%c0_14, %c0_15, %c0_16], %27 {strides = array<i32>} : memref<1x4x256xf32, #tpu.memory_space<vmem>>, vector<1x4x256xf32>,
    return
  }
  func.func @transform_0(%arg0: i32, %arg1: i32) -> (i32, i32, i32) {
    %c0_i32 = arith.constant 0 : i32
    %c0_i32_0 = arith.constant 0 : i32
    return %arg0, %c0_i32, %arg1 : i32, i32, i32
  }
  func.func @transform_1(%arg0: i32, %arg1: i32) -> (i32, i32, i32) {
    %c0_i32 = arith.constant 0 : i32
    %c0_i32_0 = arith.constant 0 : i32
    return %arg0, %c0_i32, %arg1 : i32, i32, i32
  }
}

</mosaic_0001>

<bundles_post_ra>
// kernel: tpu_custom_call.1
= control target key start
LH: loop header
LB: loop body
LE: loop exit
PB: predicated region body
PF: predicated region fallthrough
CT: control target
= control target key end

     0   :  { %6 = vsyncpa [#allocation4], 0  ;;  %s717_s0 = inlined_call_operand.hbm [shape: f32[2,4,256], index: 0, kind: input, shape index: {}]   ;;  %s718_s1 = inlined_call_operand.hbm [shape: f32[2,4,256], index: 1, kind: output, shape index: {}]  }
   0x1   :  { %8 = vsyncpa [#allocation4 + $0x1], 0 }
   0x2   :  { %9 = vsyncpa [#allocation5], 0 }
   0x3   :  { %11 = vsyncpa [#allocation5 + $0x1], 0  ;;  %s539_s6 = smov 0   ;;  %s541_s7 = smov 0  }
   0x4   :  { %s543_s8 = smov 0   ;;  %s545_s9 = smov 0  }
   0x5   :  { %s547_s10 = smov 0   ;;  %s549_s11 = smov 0  }
   0x6 LB: > { %s326_s12 = sadd.s32 4294967295, %s524_s11   ;;  %s327_s13 = sadd.s32 4294967294, %s524_s11   ;;  %s524_s11 = sphi %s549_s11, %s17_s11   ;;  %s520_s10 = sphi %s547_s10, %s734_s10   ;;  %s516_s9 = sphi %s545_s9, %s733_s9   ;;  %s512_s8 = sphi %s543_s8, %s732_s8   ;;  %s508_s7 = sphi %s541_s7, %s731_s7   ;;  %s504_s6 = sphi %s539_s6, %s730_s6  }
   0x7   : > { %s29_s14 = sadd.s32 1, %s520_s10  ;;  %s38_s15 = sadd.s32 1, %s512_s8 }
   0x8   : > { %p31_p0 = scmp.ge.s32.totalorder %s29_s14, 2  ;;  %p45_p1 = scmp.ne.s32.totalorder %s512_s8, %s508_s7 }
   0x9   : > { %p46_p2 = scmp.eq.s32.totalorder %s524_s11, 0  ;;  %p51_p3 = scmp.ne.s32.totalorder %s508_s7, %s504_s6 }
   0xa   : > { %s736_s14 = smov (%p31_p0, %s29_s14), 0  ;;  %p52_p5 = scmp.eq.s32.totalorder %s326_s12, 0 }
   0xb   : > { %p580_p4 = por %p46_p2, %p45_p1  ;;  %s33_s17 = ssub.s32 %s520_s10, %s736_s14 }
   0xc   : > { %p77_p6 = scmp.eq.s32.totalorder %s326_s12, 1  ;;  %p36_p7 = scmp.eq.s32.totalorder %s33_s17, 0 }
   0xd   : > { %p586_p8 = por %p52_p5, %p51_p3  ;;  %p83_p10 = scmp.eq.s32.totalorder %s327_s13, 1 }
   0xe   : > { %p590_p9 = por %p77_p6, %p45_p1  ;;  %p357_p13 = scmp.lt.s32.totalorder %s524_s11, 2 }
   0xf   : > { %s595_s20 = scalar_select %p36_p7, %s512_s8, %s38_s15  }
  0x10   : > { %s722_s19 = scalar_select %p590_p9, 1, 0 }
  0x11   : > { %p597_p11 = por %p83_p10, %p51_p3  ;;  %s103_s22 = sand.u32 1, %s512_s8  }
  0x12   : > { %s330_s23 = sshll.u32 %s103_s22, 3  ;;  %s343_s24 = sshll.u32 %s520_s10, 7 }
  0x13   : > { %s723_s21 = scalar_select %p597_p11, 1, 0 }
  0x14   : > { %s608_s27 = scalar_lea.hbm %s717_s0, %s343_s24  ;;  %s107_s28 = scalar_lea.vmem [#allocation3], %s330_s23 }
  0x15   : > { %s117_s29 = sshll.u32 %s107_s28, 4  ;;  %p614_p0 = pnand %p357_p13, %p580_p4  ;;  %s610_s29 = int_to_ptr.vmem [resolvable:$true] %s117_s29 }
  0x16   : > { %s104_s2 = scalar_lea.sflag [#allocation4], %s103_s22  ;;  %s412_s3 = scalar_lea.hbm %s608_s27, 128 }
  0x17   : > { %p413_p3 = scmp.ne.s32.totalorder %s608_s27, %s412_s3  ;;  %p414_p5 = pneg %p614_p0 }
  0x18   : > { %s417_s12 = scalar_lea.hbm %s717_s0, 256  ;;  %p418_p4 = scmp.lt.u32.totalorder %s608_s27, %s717_s0 }
  0x19   : > { %p415_p6 = pnand %p414_p5, %p413_p3  ;;  %p419_p10 = scmp.lt.u32.totalorder %s417_s12, %s412_s3 }
  0x1a   : > { %p421_p12 = scmp.lt.u32.totalorder %s412_s3, %s608_s27 }
  0x1b   : > { %p416_p7 = pneg %p415_p6  ;;  %p420_p13 = por %p419_p10, %p418_p4 }
  0x1d   : > { %p422_p1 = por %p421_p12, %p420_p13 }
  0x1f   : > { %p423_p2 = pnand %p422_p1, %p416_p7 }
  0x21   : > { %426 = shalt.err (!%p423_p2)
}
  0x22   : > { %s427_s16 = scalar_lea.vmem %s610_s29, 128  ;;  %s526_s17 = smov [#allocation3]  }
  0x23   : > { %p428_p3 = scmp.ne.s32.totalorder %s610_s29, %s427_s16  ;;  %s432_s22 = sshll.u32 %s526_s17, 4  ;;  %s433_s22 = int_to_ptr.vmem [resolvable:$false] %s432_s22 }
  0x24   : > { %s434_s23 = scalar_lea.vmem %s433_s22, 256  ;;  %p435_p9 = scmp.lt.s32.totalorder %s610_s29, %s433_s22 }
  0x25   : > { %p430_p6 = pnand %p428_p3, %p414_p5  ;;  %p436_p4 = scmp.lt.s32.totalorder %s434_s23, %s427_s16 }
  0x27   : > { %p431_p11 = pneg %p430_p6  ;;  %p437_p10 = por %p436_p4, %p435_p9 }
  0x29   : > { %p438_p12 = pnand %p437_p10, %p431_p11 }
  0x2b   : > { %441 = shalt.err (!%p438_p12)
}
  0x2c   : > { %352 = dma.hbm_to_vmem [thread:$0]  (!%p614_p0), %s608_s27, 128, %s610_s29, %s104_s2  }
  0x2d   : > { %p725_p1 = scmp.lt.s32.totalorder %s524_s11, 3  ;;  %p726_p2 = scmp.ge.s32.totalorder %s524_s11, 1 }
  0x2f   : > { %p123_p5 = pnand %p726_p2, %p725_p1 }
  0x30   : > { %s650_s24 = sand.u32 (!%p123_p5), 1, %s508_s7  }
  0x31   : > { %126 = sbr.rel (%p123_p5) target bundleno = 132 (0x84), region = 24  ;;  %s334_s25 = sshll.u32 (!%p123_p5), %s650_s24, 3 }
  0x32   : > { %s129_s26 = scalar_lea.sflag (!%p123_p5), [#allocation4], %s650_s24  ;;  %s132_s28 = scalar_lea.vmem (!%p123_p5), [#allocation3], %s334_s25 }
  0x38   : > { %495 = dma.done.wait (%p586_p8), %s129_s26, 128  }
  0x39   : > { %497 = vsyncadd (%p586_p8), %s129_s26, 4294967168  ;;  %v527_v0 = vmov 0.0   ;;  %v153_v1 = vld [vmem:[%s132_s28] sm:$0xff]  ;;  %vm195_vm0 = vcmask 1040384   ;;  %vm196_vm1 = vcmask 1044484   ;;  %vm180_vm2 = vcmask 1042432  }
  0x3a   : > { %155 = vst [vmem:[#allocation2] sm:$0x3] %v527_v0  ;;  %156 = vst [vmem:[#allocation2 + $0x8] sm:$0x3] %v527_v0  ;;  %v154_v2 = vmul.f32 %v153_v1, %v153_v1  ;;  %vm181_vm3 = vcmask 1046532   ;;  %s150_s18 = scalar_lea.vmem [#allocation6], %s334_s25 }
  0x3b   : > { %165 = vst [vmem:[#allocation2] sm:$0xc0] %v527_v0  ;;  %166 = vst [vmem:[#allocation2 + $0x8] sm:$0xc0] %v527_v0  ;;  %s242_s27 = sshll.u32 %s150_s18, 4  ;;  %s344_s29 = sshll.u32 %s516_s9, 7  ;;  %s665_s27 = int_to_ptr.vmem [resolvable:$true] %s242_s27 }
  0x3c   : > { %v159_v3 = vrot.slane %v154_v2, 6  ;;  %v158_v4 = vcombine.high %v154_v2, %v154_v2  ;;  %vm182_vm4 = vmor %vm180_vm2, %vm181_vm3  ;;  %s670_s3 = scalar_lea.hbm %s718_s1, %s344_s29  ;;  %s226_s4 = scalar_lea.sflag [#allocation5], %s650_s24 }
  0x3d   : > { %vm197_vm5 = vmor %vm195_vm0, %vm196_vm1  ;;  %s442_s5 = scalar_lea.vmem %s665_s27, 128  ;;  %p727_p9 = scmp.ne.s32.totalorder %s722_s19, 0 }
  0x3e   : > { %163 = vst [vmem:[#allocation2] sm:$0x3c] %v159_v3  ;;  %v160_v5 = vrot.slane %v158_v4, 6  ;;  %p443_p8 = scmp.ne.s32.totalorder %s665_s27, %s442_s5  ;;  %s528_s9 = smov [#allocation6]  }
  0x3f   : > { %s446_s12 = sshll.u32 %s528_s9, 4  ;;  %s447_s12 = int_to_ptr.vmem [resolvable:$false] %s446_s12 }
  0x40   : > { %164 = vst [vmem:[#allocation2 + $0x8] sm:$0x3c] %v160_v5  ;;  %p444_p11 = pnand %p443_p8, %p727_p9  ;;  %s448_s13 = scalar_lea.vmem %s447_s12, 256 }
  0x41   : > { %p449_p7 = scmp.lt.s32.totalorder %s665_s27, %s447_s12  ;;  %p450_p13 = scmp.lt.s32.totalorder %s448_s13, %s442_s5 }
  0x42   : > { %p445_p0 = pneg %p444_p11 }
  0x43   : > { %p451_p3 = por %p450_p13, %p449_p7 }
  0x45   : > { %v167_v6 = vld [vmem:[#allocation2] sm:$0xf]  ;;  %v204_v22 = vld [vmem:[#allocation2] sm:$0xf0]  ;;  %p452_p6 = pnand %p451_p3, %p445_p0 }
  0x46   : > { %v174_v7 = vld [vmem:[#allocation2] sm:$0x1e] }
  0x47   : > { %v189_v8 = vld [vmem:[#allocation2] sm:$0x78]  ;;  %v168_v9 = vld [vmem:[#allocation2 + $0x8] sm:$0xf]  ;;  %v205_v24 = vld [vmem:[#allocation2 + $0x8] sm:$0xf0] }
  0x48   : > { %v175_v10 = vld [vmem:[#allocation2 + $0x8] sm:$0x1e]  ;;  %v171_v12 = vcombine.low %v167_v6, %v168_v9  ;;  %v208_v28 = vcombine.high %v204_v22, %v205_v24 }
  0x49   : > { %v190_v11 = vld [vmem:[#allocation2 + $0x8] sm:$0x78]  ;;  %v178_v13 = vcombine.low %v174_v7, %v175_v10  ;;  %v179_v14 = vcombine.high %v174_v7, %v175_v10 }
  0x4a   : > { %v193_v15 = vcombine.low %v189_v8, %v190_v11  ;;  %v194_v16 = vcombine.high %v189_v8, %v190_v11  ;;  %v173_v17 = vadd.f32 %v171_v12, %v154_v2 }
  0x4b   : > { %v336_v18 = vrot.slane %v178_v13, 9  ;;  %v185_v19 = vrot.slane %v179_v14, 5 }
  0x4c   : > { %v337_v20 = vrot.slane %v193_v15, 11  ;;  %v200_v21 = vrot.slane %v194_v16, 7 }
  0x4d   : > { %v186_v23 = vsel %vm182_vm4, %v336_v18, %v185_v19 }
  0x4e   : > { %v188_v25 = vadd.f32 %v186_v23, %v173_v17  ;;  %v201_v26 = vsel %vm197_vm5, %v337_v20, %v200_v21 }
  0x50   : > { %v203_v27 = vadd.f32 %v201_v26, %v188_v25 }
  0x52   : > { %v210_v29 = vadd.f32 %v208_v28, %v203_v27 }
  0x54   : > { %v211_v30 = vmul.f32 2e-05, %v210_v29 }
  0x56   : > { %v212_v31 = vadd.f32 2.0, %v211_v30 }
  0x58   : > { %408 = vrsqrt.f32 %v212_v31  ;;  %vm216_vm6 = vcmp.eq.f32.partialorder %v212_v31, inf  ;;  %v219_v34 = vand.u32 2147483648, %v212_v31  ;;  %vm218_vm7 = vcmp.eq.f32.partialorder %v212_v31, 0.0 }
  0x62   : > { %v409_v32 = vpop.eup %408 }
  0x63   : > { %v215_v33 = vmul.f32 %v409_v32, %v212_v31 }
  0x65   : > { %v217_v35 = vsel %vm216_vm6, %v212_v31, %v215_v33 }
  0x66   : > { %v220_v36 = vsel %vm218_vm7, %v219_v34, %v217_v35 }
  0x67   : > { %410 = vrsqrt.f32 %v220_v36 }
  0x71   : > { %v411_v37 = vpop.eup %410 }
  0x72   : > { %v222_v38 = vmul.f32 %v411_v37, %v409_v32 }
  0x74   : > { %v223_v39 = vmul.f32 %v222_v38, %v153_v1 }
  0x76   : > { %224 = vst [vmem:[%s150_s18] sm:$0xff] %v223_v39 }
  0x77   : > { %455 = shalt.err (!%p452_p6)
}
  0x78   : > { %s456_s15 = scalar_lea.hbm %s670_s3, 128  ;;  %s460_s22 = scalar_lea.hbm %s718_s1, 256 }
  0x79   : > { %p457_p4 = scmp.ne.s32.totalorder %s670_s3, %s456_s15  ;;  %p461_p1 = scmp.lt.u32.totalorder %s670_s3, %s718_s1 }
  0x7a   : > { %p462_p2 = scmp.lt.u32.totalorder %s460_s22, %s456_s15  ;;  %p464_p8 = scmp.lt.u32.totalorder %s456_s15, %s670_s3 }
  0x7b   : > { %p458_p10 = pnand %p457_p4, %p727_p9 }
  0x7c   : > { %p463_p5 = por %p462_p2, %p461_p1 }
  0x7d   : > { %p459_p12 = pneg %p458_p10 }
  0x7e   : > { %p465_p11 = por %p464_p8, %p463_p5 }
  0x80   : > { %p466_p0 = pnand %p465_p11, %p459_p12 }
  0x82   : > { %469 = shalt.err (!%p466_p0)
}
  0x83   : > { %347 = dma.vmem_to_hbm [thread:$0]  (%p727_p9), %s665_s27, 128, %s670_s3, %s226_s4  }
  0x84 PF: > { %s254_s25 = sand.u32 1, %s504_s6   ;;  %p728_p7 = scmp.ne.s32.totalorder %s723_s21, 0 }
  0x85   : > { %p729_p13 = scmp.ge.s32.totalorder %s524_s11, 2  ;;  %s255_s26 = scalar_lea.sflag [#allocation5], %s254_s25 }
  0x87   : > { %p354_p3 = pnand %p729_p13, %p728_p7 }
  0x89   : > { %499 = dma.done.wait (!%p354_p3), %s255_s26, 128  }
  0x8a   : > { %501 = vsyncadd (!%p354_p3), %s255_s26, 4294967168  ;;  %s17_s11 = sadd.s32 1, %s524_s11   ;;  %s730_s6 = smov %s508_s7 }
  0x8b   : > { %p14_p6 = scmp.ge.s32.totalorder %s17_s11, 4   ;;  %s731_s7 = smov %s512_s8 }
  0x8c   : > { %s732_s8 = smov %s595_s20  ;;  %s733_s9 = smov %s520_s10 }
  0x8d   : > { %s734_s10 = smov %s736_s14  ;;  %16 = sbr.rel (!%p14_p6) target bundleno = 6 (0x6), region = 69 }
  0x94   :  { %260 = vsyncpa [#allocation4], 1 }
  0x95   :  { %262 = vsyncpa [#allocation4 + $0x1], 1 }
  0x96   :  { %263 = vsyncpa [#allocation5], 1 }
  0x97   :  { %265 = vsyncpa [#allocation5 + $0x1], 1 }

</bundles_post_ra>
